<compile_context>
chip_gen: v7x
topology: tpu7x:2x2x1
jax: 0.10.0
libtpu: 0.0.40
codegen_flags: <defaults>
</compile_context>

<pallas_src>
import functools

import jax
import jax.numpy as jnp
from jax.experimental import pallas as pl
from jax.experimental.pallas import tpu as pltpu

EPS = 1e-5
LANE = 128
_MAX_TILE_M = 256            # safe for v7x's 64 MiB VMEM with double buffering
_VMEM_LIMIT = 48 * 1024 * 1024


def _round_up(x, m):
    return ((x + m - 1) // m) * m


def _pick_tile_m(m, max_tile=_MAX_TILE_M):
    """Largest divisor of m that is <= max_tile and sublane friendly."""
    for t in range(min(m, max_tile), 0, -1):
        if m % t == 0 and (t % 8 == 0 or t == m):
            return t
    return m


# ----------------------------------------------------------------------------
# Kernels
# ----------------------------------------------------------------------------
def _spike(x, scale, shift, thr, if_spike):
    """Folded BN affine + Hoyer binary activation (spike_type='sum')."""
    y = x * scale + shift
    c = jnp.clip(y, 0.0, 1.0)
    if if_spike:
        return jnp.where(c >= thr, 1.0, 0.0)
    return jnp.where(c < thr, 0.0, c)


def _hoyer_stats_kernel(x_ref, scale_ref, shift_ref, o_ref):
    """Pass 1: per-M-tile partial sums.  o[0,0,0]=sum(c^2), o[0,0,1]=sum(|c|)."""
    y = x_ref[...] * scale_ref[...] + shift_ref[...]
    c = jnp.clip(y, 0.0, 1.0)
    ssq = jnp.sum(c * c)
    sab = jnp.sum(jnp.abs(c))
    sub = jax.lax.broadcasted_iota(jnp.int32, o_ref.shape, 1)
    lane = jax.lax.broadcasted_iota(jnp.int32, o_ref.shape, 2)
    o_ref[...] = jnp.where((sub == 0) & (lane == 0), ssq,
                           jnp.where((sub == 0) & (lane == 1), sab, 0.0))


def _spike_mm_kernel(x_ref, sc_ref, sh_ref, thr_ref, w_ref, o_ref, *, if_spike):
    s = _spike(x_ref[...], sc_ref[...], sh_ref[...], thr_ref[...], if_spike)
    a = s.astype(w_ref.dtype) if if_spike else s
    o_ref[...] = jnp.dot(a, w_ref[...],
                         preferred_element_type=jnp.float32).astype(o_ref.dtype)


def _spike_mm_res_kernel(x_ref, sc_ref, sh_ref, thr_ref, w_ref, r_ref, o_ref,
                         *, if_spike):
    s = _spike(x_ref[...], sc_ref[...], sh_ref[...], thr_ref[...], if_spike)
    a = s.astype(w_ref.dtype) if if_spike else s
    o_ref[...] = (jnp.dot(a, w_ref[...], preferred_element_type=jnp.float32)
                  + r_ref[...]).astype(o_ref.dtype)


def _spike_mm_dual_kernel(x1_ref, sc1_ref, sh1_ref, t1_ref, w1_ref,
                          x2_ref, sc2_ref, sh2_ref, t2_ref, w2_ref, o_ref,
                          *, if_spike):
    """conv3 path + fused downsample path (both spike matmuls), summed."""
    s1 = _spike(x1_ref[...], sc1_ref[...], sh1_ref[...], t1_ref[...], if_spike)
    s2 = _spike(x2_ref[...], sc2_ref[...], sh2_ref[...], t2_ref[...], if_spike)
    a1 = s1.astype(w1_ref.dtype) if if_spike else s1
    a2 = s2.astype(w2_ref.dtype) if if_spike else s2
    acc = jnp.dot(a1, w1_ref[...], preferred_element_type=jnp.float32)
    acc = acc + jnp.dot(a2, w2_ref[...], preferred_element_type=jnp.float32)
    o_ref[...] = acc.astype(o_ref.dtype)


def _conv3x3_spike_kernel(x_ref, sc_ref, sh_ref, thr_ref, w_ref, o_ref,
                          sp_ref, acc_ref, *, H, W, if_spike):
    """bn2+spike fused 3x3 conv (pad=1, stride=1) for one image (grid over N).

    Builds a zero-padded spike slab in VMEM and runs 9 accumulating MXU dots
    on shifted views (no HBM im2col).
    """
    C = x_ref.shape[-1]
    s = _spike(x_ref[...], sc_ref[...], sh_ref[...], thr_ref[...], if_spike)
    sp_ref[...] = jnp.zeros_like(sp_ref)          # zero borders every step
    sp_ref[1:H + 1, 1:W + 1, :] = s.reshape(H, W, C)
    for idx in range(9):
        ky, kx = idx // 3, idx % 3
        a = sp_ref[ky:ky + H, kx:kx + W, :].reshape(H * W, C)
        if if_spike:
            a = a.astype(w_ref.dtype)
        part = jnp.dot(a, w_ref[idx], preferred_element_type=jnp.float32)
        if idx == 0:
            acc_ref[...] = part
        else:
            acc_ref[...] += part
    o_ref[...] = acc_ref[...].astype(o_ref.dtype)


# ----------------------------------------------------------------------------
# pallas_call wrappers
# ----------------------------------------------------------------------------
def _cparams():
    return pltpu.CompilerParams(dimension_semantics=("parallel",),
                                vmem_limit_bytes=_VMEM_LIMIT)


def hoyer_threshold(x2d, scale, shift, x_thr_scale):
    """Two-pass Hoyer: tiled partial sums -> global scalar threshold."""
    M, C = x2d.shape
    tile_m = _pick_tile_m(M)
    nt = M // tile_m
    partials = pl.pallas_call(
        _hoyer_stats_kernel,
        grid=(nt,),
        in_specs=[pl.BlockSpec((tile_m, C), lambda i: (i, 0)),
                  pl.BlockSpec((1, C), lambda i: (0, 0)),
                  pl.BlockSpec((1, C), lambda i: (0, 0))],
        out_specs=pl.BlockSpec((1, 8, LANE), lambda i: (i, 0, 0)),
        out_shape=jax.ShapeDtypeStruct((nt, 8, LANE), jnp.float32),
        compiler_params=_cparams(),
        cost_estimate=pl.CostEstimate(flops=4 * M * C, transcendentals=0,
                                      bytes_accessed=4 * M * C),
    )(x2d, scale, shift)
    tot = jnp.sum(partials, axis=(0, 1))
    # guard against all-zero clamped activations (NaN threshold)
    return x_thr_scale * tot[0] / jnp.maximum(tot[1], 1e-12)


def spike_matmul(x, scale, shift, thr, w, *, residual=None, if_spike=True):
    M, K = x.shape
    Nout = w.shape[-1]
    tile_m = _pick_tile_m(M)
    thr2d = jnp.broadcast_to(thr.astype(jnp.float32), (1, K))
    in_specs = [pl.BlockSpec((tile_m, K), lambda i: (i, 0)),
                pl.BlockSpec((1, K), lambda i: (0, 0)),
                pl.BlockSpec((1, K), lambda i: (0, 0)),
                pl.BlockSpec((1, K), lambda i: (0, 0)),
                pl.BlockSpec((K, Nout), lambda i: (0, 0))]
    args = [x, scale, shift, thr2d, w]
    bytes_acc = 4 * M * K + 2 * K * Nout + 4 * M * Nout
    if residual is None:
        kern = functools.partial(_spike_mm_kernel, if_spike=if_spike)
    else:
        kern = functools.partial(_spike_mm_res_kernel, if_spike=if_spike)
        in_specs = in_specs + [pl.BlockSpec((tile_m, Nout), lambda i: (i, 0))]
        args = args + [residual]
        bytes_acc += 4 * M * Nout
    return pl.pallas_call(
        kern,
        grid=(M // tile_m,),
        in_specs=in_specs,
        out_specs=pl.BlockSpec((tile_m, Nout), lambda i: (i, 0)),
        out_shape=jax.ShapeDtypeStruct((M, Nout), jnp.float32),
        compiler_params=_cparams(),
        cost_estimate=pl.CostEstimate(flops=2 * M * K * Nout, transcendentals=0,
                                      bytes_accessed=bytes_acc),
    )(*args)


def spike_matmul_dual(x1, sc1, sh1, t1, w1, x2, sc2, sh2, t2, w2, *,
                      if_spike=True):
    M, K1 = x1.shape
    K2 = x2.shape[1]
    Nout = w1.shape[-1]
    tile_m = _pick_tile_m(M)
    t1b = jnp.broadcast_to(t1.astype(jnp.float32), (1, K1))
    t2b = jnp.broadcast_to(t2.astype(jnp.float32), (1, K2))
    in_specs = [pl.BlockSpec((tile_m, K1), lambda i: (i, 0)),
                pl.BlockSpec((1, K1), lambda i: (0, 0)),
                pl.BlockSpec((1, K1), lambda i: (0, 0)),
                pl.BlockSpec((1, K1), lambda i: (0, 0)),
                pl.BlockSpec((K1, Nout), lambda i: (0, 0)),
                pl.BlockSpec((tile_m, K2), lambda i: (i, 0)),
                pl.BlockSpec((1, K2), lambda i: (0, 0)),
                pl.BlockSpec((1, K2), lambda i: (0, 0)),
                pl.BlockSpec((1, K2), lambda i: (0, 0)),
                pl.BlockSpec((K2, Nout), lambda i: (0, 0))]
    return pl.pallas_call(
        functools.partial(_spike_mm_dual_kernel, if_spike=if_spike),
        grid=(M // tile_m,),
        in_specs=in_specs,
        out_specs=pl.BlockSpec((tile_m, Nout), lambda i: (i, 0)),
        out_shape=jax.ShapeDtypeStruct((M, Nout), jnp.float32),
        compiler_params=_cparams(),
        cost_estimate=pl.CostEstimate(
            flops=2 * M * (K1 + K2) * Nout, transcendentals=0,
            bytes_accessed=4 * M * (K1 + K2) + 2 * (K1 + K2) * Nout + 4 * M * Nout),
    )(x1, sc1, sh1, t1b, w1, x2, sc2, sh2, t2b, w2)


def conv3x3_spike(x2d, scale, shift, thr, w9, N, H, W, *, if_spike=True):
    M, C = x2d.shape
    assert M == N * H * W
    Cout = w9.shape[-1]
    # TODO(synk): halo-tiled H path for very large H*W and W not multiple of 8.
    assert W % 8 == 0 and (H * W) % 8 == 0, "conv2 kernel needs W % 8 == 0"
    HW = H * W
    thr2d = jnp.broadcast_to(thr.astype(jnp.float32), (1, C))
    kern = functools.partial(_conv3x3_spike_kernel, H=H, W=W, if_spike=if_spike)
    return pl.pallas_call(
        kern,
        grid=(N,),
        in_specs=[pl.BlockSpec((HW, C), lambda n: (n, 0)),
                  pl.BlockSpec((1, C), lambda n: (0, 0)),
                  pl.BlockSpec((1, C), lambda n: (0, 0)),
                  pl.BlockSpec((1, C), lambda n: (0, 0)),
                  pl.BlockSpec((9, C, Cout), lambda n: (0, 0, 0))],
        out_specs=pl.BlockSpec((HW, Cout), lambda n: (n, 0)),
        out_shape=jax.ShapeDtypeStruct((M, Cout), jnp.float32),
        scratch_shapes=[pltpu.VMEM((H + 2, W + 2, C), jnp.float32),
                        pltpu.VMEM((HW, Cout), jnp.float32)],
        compiler_params=_cparams(),
        cost_estimate=pl.CostEstimate(
            flops=2 * M * 9 * C * Cout, transcendentals=0,
            bytes_accessed=4 * M * C + 2 * 9 * C * Cout + 4 * M * Cout),
    )(x2d, scale, shift, thr2d, w9)


# ----------------------------------------------------------------------------
# Parameter construction (deterministic, synthetic)
# ----------------------------------------------------------------------------
def _bn_init(key, c):
    k1, k2, k3, k4 = jax.random.split(key, 4)
    gamma = jax.random.uniform(k1, (c,), jnp.float32, 0.5, 1.5)
    beta = 0.1 * jax.random.normal(k2, (c,), jnp.float32)
    mean = 0.1 * jax.random.normal(k3, (c,), jnp.float32)
    var = jax.random.uniform(k4, (c,), jnp.float32, 0.5, 1.5)
    return (gamma, beta, mean, var)


def init_bottleneck_params(key, inplanes, planes, stride=1, expansion=4):
    keys = jax.random.split(key, 8)
    out_planes = expansion * planes
    p = {
        "bn1": _bn_init(keys[0], inplanes),
        "bn2": _bn_init(keys[1], planes),
        "bn3": _bn_init(keys[2], planes),
        # conv1: torch [planes, inplanes, 1, 1]   -> [inplanes, planes]
        "conv1_w": 0.2 * jax.random.normal(keys[3], (inplanes, planes), jnp.float32),
        # conv2: torch [planes, planes, 3, 3]     -> HWIO [3, 3, planes, planes]
        "conv2_w": 0.2 * jax.random.normal(keys[4], (3, 3, planes, planes), jnp.float32),
        # conv3: torch [out_planes, planes, 1, 1] -> [planes, out_planes]
        "conv3_w": 0.2 * jax.random.normal(keys[5], (planes, out_planes), jnp.float32),
        "act1_thr": 1.0,
        "act2_thr": 1.0,
        "act3_thr": 1.0,
        "downsample": None,
    }
    if stride != 1 or inplanes != out_planes:
        p["downsample"] = {
            "bn": _bn_init(keys[6], inplanes),
            "act_thr": 1.0,
            "conv_w": 0.2 * jax.random.normal(keys[7], (inplanes, out_planes),
                                              jnp.float32),
        }
    return p


def _fold_bn(bn, act_thr, c_pad):
    gamma, beta, mean, var = bn
    inv = 1.0 / jnp.sqrt(var + EPS)
    scale = gamma * inv / act_thr
    shift = (beta - gamma * mean * inv) / act_thr
    c = scale.shape[0]
    if c_pad > c:
        scale = jnp.pad(scale, (0, c_pad - c))
        shift = jnp.pad(shift, (0, c_pad - c))
    return scale[None, :].astype(jnp.float32), shift[None, :].astype(jnp.float32)


def _pad2(w, k_pad, n_pad):
    return jnp.pad(w, ((0, k_pad - w.shape[0]), (0, n_pad - w.shape[1])))


# ----------------------------------------------------------------------------
# Bottleneck forward
# ----------------------------------------------------------------------------
def bottleneck_forward(params, x_nchw, *, stride=1, x_thr_scale=1.0,
                       if_spike=True, expansion=4):
    # TODO(synk): stride > 1 (MaxPool + strided 3x3 conv) and the explicit
    # multi-time-step (T) axis of HoyerBiAct_multi_step are not modelled.
    assert stride == 1, "stride > 1 not implemented"
    N, Cin, H, W = x_nchw.shape
    planes = params["conv1_w"].shape[1]
    out_planes = expansion * planes
    cin_p = _round_up(Cin, LANE)
    planes_p = _round_up(planes, LANE)
    outp_p = _round_up(out_planes, LANE)
    M = N * H * W

    # NCHW -> NHWC -> [M, C], channels zero-padded to a multiple of 128 lanes.
    # TODO(synk): fold the boundary transpose into the kernels' index maps.
    x2d = jnp.transpose(x_nchw, (0, 2, 3, 1)).reshape(M, Cin)
    x2d_p = jnp.pad(x2d, ((0, 0), (0, cin_p - Cin)))

    sc1, sh1 = _fold_bn(params["bn1"], params["act1_thr"], cin_p)
    sc2, sh2 = _fold_bn(params["bn2"], params["act2_thr"], planes_p)
    sc3, sh3 = _fold_bn(params["bn3"], params["act3_thr"], planes_p)

    w1 = _pad2(params["conv1_w"], cin_p, planes_p).astype(jnp.bfloat16)
    w2 = jnp.pad(params["conv2_w"],
                 ((0, 0), (0, 0), (0, planes_p - planes), (0, planes_p - planes))
                 ).reshape(9, planes_p, planes_p).astype(jnp.bfloat16)
    w3 = _pad2(params["conv3_w"], planes_p, outp_p).astype(jnp.bfloat16)

    # --- stage 1: bn1 -> Hoyer spike -> conv1 (1x1), fused ---
    thr1 = hoyer_threshold(x2d_p, sc1, sh1, x_thr_scale)
    o1 = spike_matmul(x2d_p, sc1, sh1, thr1, w1, if_spike=if_spike)

    # --- stage 2: bn2 -> Hoyer spike -> conv2 (3x3, pad=1), fused, no im2col ---
    thr2 = hoyer_threshold(o1, sc2, sh2, x_thr_scale)
    o2 = conv3x3_spike(o1, sc2, sh2, thr2, w2, N, H, W, if_spike=if_spike)

    # --- stage 3: bn3 -> Hoyer spike -> conv3 (1x1) + residual, fused ---
    thr3 = hoyer_threshold(o2, sc3, sh3, x_thr_scale)
    if params["downsample"] is not None:
        ds = params["downsample"]
        # MaxPool2d(kernel_size=1, stride=1) is the identity for stride == 1.
        scd, shd = _fold_bn(ds["bn"], ds["act_thr"], cin_p)
        wd = _pad2(ds["conv_w"], cin_p, outp_p).astype(jnp.bfloat16)
        thrd = hoyer_threshold(x2d_p, scd, shd, x_thr_scale)
        out2d = spike_matmul_dual(o2, sc3, sh3, thr3, w3,
                                  x2d_p, scd, shd, thrd, wd, if_spike=if_spike)
    else:
        out2d = spike_matmul(o2, sc3, sh3, thr3, w3,
                             residual=x2d_p, if_spike=if_spike)

    out = out2d[:, :out_planes].reshape(N, H, W, out_planes)
    return jnp.transpose(out, (0, 3, 1, 2))


# ----------------------------------------------------------------------------
# Pure-jnp reference (same math, no Pallas / no padding) for verification
# ----------------------------------------------------------------------------
def _ref_act(x2d, bn, act_thr, x_thr_scale, if_spike):
    gamma, beta, mean, var = bn
    inv = 1.0 / jnp.sqrt(var + EPS)
    y = (x2d * (gamma * inv / act_thr)[None, :]
         + ((beta - gamma * mean * inv) / act_thr)[None, :])
    c = jnp.clip(y, 0.0, 1.0)
    thr = x_thr_scale * jnp.sum(c * c) / jnp.maximum(jnp.sum(jnp.abs(c)), 1e-12)
    return jnp.where(c >= thr, 1.0, 0.0) if if_spike else jnp.where(c < thr, 0.0, c)


def bottleneck_reference(params, x_nchw, *, x_thr_scale=1.0, if_spike=True,
                         expansion=4):
    N, Cin, H, W = x_nchw.shape
    planes = params["conv1_w"].shape[1]
    out_planes = expansion * planes
    bf = lambda w: w.astype(jnp.bfloat16).astype(jnp.float32)
    x2d = jnp.transpose(x_nchw, (0, 2, 3, 1)).reshape(N * H * W, Cin)
    s1 = _ref_act(x2d, params["bn1"], params["act1_thr"], x_thr_scale, if_spike)
    o1 = s1 @ bf(params["conv1_w"])
    s2 = _ref_act(o1, params["bn2"], params["act2_thr"], x_thr_scale, if_spike)
    s2p = jnp.pad(s2.reshape(N, H, W, planes), ((0, 0), (1, 1), (1, 1), (0, 0)))
    w2 = bf(params["conv2_w"])
    o2 = jnp.zeros((N, H, W, planes), jnp.float32)
    for ky in range(3):
        for kx in range(3):
            o2 = o2 + jnp.einsum("nhwc,co->nhwo",
                                 s2p[:, ky:ky + H, kx:kx + W, :], w2[ky, kx])
    o2 = o2.reshape(N * H * W, planes)
    s3 = _ref_act(o2, params["bn3"], params["act3_thr"], x_thr_scale, if_spike)
    if params["downsample"] is not None:
        ds = params["downsample"]
        sd = _ref_act(x2d, ds["bn"], ds["act_thr"], x_thr_scale, if_spike)
        res = sd @ bf(ds["conv_w"])
    else:
        res = x2d
    out2d = s3 @ bf(params["conv3_w"]) + res
    return jnp.transpose(out2d.reshape(N, H, W, out_planes), (0, 3, 1, 2))


# ----------------------------------------------------------------------------
if __name__ == "__main__":
    key = jax.random.PRNGKey(0)
    configs = [
        # (N, inplanes, planes, H, W): downsample branch (inplanes != 4*planes)
        (2, 16, 8, 16, 16),
        # identity residual branch (inplanes == 4*planes)
        (1, 32, 8, 8, 8),
    ]
    for idx, (N, inplanes, planes, H, W) in enumerate(configs):
        kp, kx = jax.random.split(jax.random.fold_in(key, idx))
        params = init_bottleneck_params(kp, inplanes, planes, stride=1)
        x = jax.random.normal(kx, (N, inplanes, H, W), jnp.float32)

        out = jax.block_until_ready(bottleneck_forward(params, x, stride=1))
        ref = jax.block_until_ready(bottleneck_reference(params, x))

        assert out.shape == (N, 4 * planes, H, W), out.shape
        err = float(jnp.max(jnp.abs(out - ref)))
        assert err < 2e-3, f"config {idx}: max abs err {err}"

    print("KERNEL_OK")
</pallas_src>

<mosaic_0001>
module attributes {stable_mosaic.version = 11 : i64} {
  func.func @_hoyer_stats_kernel(%arg0: i32, %arg1: memref<256x128xf32, #tpu.memory_space<vmem>>, %arg2: memref<1x128xf32, #tpu.memory_space<vmem>>, %arg3: memref<1x128xf32, #tpu.memory_space<vmem>>, %arg4: memref<1x8x128xf32, #tpu.memory_space<vmem>>) attributes {dimension_semantics = [#tpu.dimension_semantics<parallel>], iteration_bounds = array<i64: 2>, scalar_prefetch = 0 : i64, scratch_operands = 0 : i64, tpu.core_type = #tpu.core_type<tc>, window_params = [{transform_indices = @transform_0, window_bounds = array<i64: 256, 128>}, {pipeline_mode = #tpu.pipeline_mode<synchronous>, transform_indices = @transform_1, window_bounds = array<i64: 1, 128>}, {pipeline_mode = #tpu.pipeline_mode<synchronous>, transform_indices = @transform_2, window_bounds = array<i64: 1, 128>}, {transform_indices = @transform_3, window_bounds = array<i64: 1, 8, 128>}]} {
    %c0 = arith.constant 0 : index
    %c0_0 = arith.constant 0 : index
    %0 = vector.load %arg1[%c0, %c0_0] : memref<256x128xf32, #tpu.memory_space<vmem>>, vector<256x128xf32>
    %c0_1 = arith.constant 0 : index
    %c0_2 = arith.constant 0 : index
    %1 = vector.load %arg2[%c0_1, %c0_2] : memref<1x128xf32, #tpu.memory_space<vmem>>, vector<1x128xf32>
    %2 = vector.broadcast %1 : vector<1x128xf32> to vector<256x128xf32>
    %3 = arith.mulf %0, %2 : vector<256x128xf32>
    %c0_3 = arith.constant 0 : index
    %c0_4 = arith.constant 0 : index
    %4 = vector.load %arg3[%c0_3, %c0_4] : memref<1x128xf32, #tpu.memory_space<vmem>>, vector<1x128xf32>
    %5 = vector.broadcast %4 : vector<1x128xf32> to vector<256x128xf32>
    %6 = arith.addf %3, %5 : vector<256x128xf32>
    %cst = arith.constant 0.000000e+00 : f32
    %cst_5 = arith.constant 1.000000e+00 : f32
    %7 = vector.broadcast %cst : f32 to vector<256x128xf32>
    %8 = arith.maximumf %7, %6 : vector<256x128xf32>
    %9 = vector.broadcast %cst_5 : f32 to vector<256x128xf32>
    %10 = arith.minimumf %9, %8 : vector<256x128xf32>
    %11 = arith.mulf %10, %10 : vector<256x128xf32>
    %12 = vector.shape_cast %11 : vector<256x128xf32> to vector<1x256x128xf32>
    %cst_6 = arith.constant dense<0.000000e+00> : vector<1xf32>
    %13 = vector.multi_reduction <add>, %12, %cst_6 [1, 2] : vector<1x256x128xf32> to vector<1xf32>
    %14 = vector.shape_cast %13 : vector<1xf32> to vector<1x1x1xf32>
    %15 = vector.extract %14[0, 0, 0] : f32 from vector<1x1x1xf32>
    %16 = math.absf %10 : vector<256x128xf32>
    %17 = vector.shape_cast %16 : vector<256x128xf32> to vector<1x256x128xf32>
    %cst_7 = arith.constant dense<0.000000e+00> : vector<1xf32>
    %18 = vector.multi_reduction <add>, %17, %cst_7 [1, 2] : vector<1x256x128xf32> to vector<1xf32>
    %19 = vector.shape_cast %18 : vector<1xf32> to vector<1x1x1xf32>
    %20 = vector.extract %19[0, 0, 0] : f32 from vector<1x1x1xf32>
    %21 = tpu.iota {dimensions = array<i32: 1>} : vector<1x8x128xi32>
    %22 = tpu.iota {dimensions = array<i32: 2>} : vector<1x8x128xi32>
    %c0_i32 = arith.constant 0 : i32
    %23 = vector.broadcast %c0_i32 : i32 to vector<1x8x128xi32>
    %24 = arith.cmpi eq, %21, %23 : vector<1x8x128xi32>
    %c0_i32_8 = arith.constant 0 : i32
    %25 = vector.broadcast %c0_i32_8 : i32 to vector<1x8x128xi32>
    %26 = arith.cmpi eq, %22, %25 : vector<1x8x128xi32>
    %27 = arith.andi %24, %26 : vector<1x8x128xi1>
    %c0_i32_9 = arith.constant 0 : i32
    %28 = vector.broadcast %c0_i32_9 : i32 to vector<1x8x128xi32>
    %29 = arith.cmpi eq, %21, %28 : vector<1x8x128xi32>
    %c1_i32 = arith.constant 1 : i32
    %30 = vector.broadcast %c1_i32 : i32 to vector<1x8x128xi32>
    %31 = arith.cmpi eq, %22, %30 : vector<1x8x128xi32>
    %32 = arith.andi %29, %31 : vector<1x8x128xi1>
    %cst_10 = arith.constant 0.000000e+00 : f32
    %33 = vector.broadcast %20 : f32 to vector<1x8x128xf32>
    %34 = vector.broadcast %cst_10 : f32 to vector<1x8x128xf32>
    %35 = arith.select %32, %33, %34 : vector<1x8x128xi1>, vector<1x8x128xf32>
    %36 = vector.broadcast %15 : f32 to vector<1x8x128xf32>
    %37 = arith.select %27, %36, %35 : vector<1x8x128xi1>, vector<1x8x128xf32>
    %c0_11 = arith.constant 0 : index
    %c0_12 = arith.constant 0 : index
    %c0_13 = arith.constant 0 : index
    %38 = vector.load %arg4[%c0_11, %c0_12, %c0_13] : memref<1x8x128xf32, #tpu.memory_space<vmem>>, vector<1x8x128xf32>
    tpu.vector_store %arg4[%c0_11, %c0_12, %c0_13], %37 {strides = array<i32>} : memref<1x8x128xf32, #tpu.memory_space<vmem>>, vector<1x8x128xf32>,
    return
  }
  func.func @transform_0(%arg0: i32) -> (i32, i32) {
    %c0_i32 = arith.constant 0 : i32
    %c0_i32_0 = arith.constant 0 : i32
    return %arg0, %c0_i32 : i32, i32
  }
  func.func @transform_1(%arg0: i32) -> (i32, i32) {
    %c0_i32 = arith.constant 0 : i32
    %c0_i32_0 = arith.constant 0 : i32
    %c0_i32_1 = arith.constant 0 : i32
    return %c0_i32, %c0_i32_0 : i32, i32
  }
  func.func @transform_2(%arg0: i32) -> (i32, i32) {
    %c0_i32 = arith.constant 0 : i32
    %c0_i32_0 = arith.constant 0 : i32
    %c0_i32_1 = arith.constant 0 : i32
    return %c0_i32, %c0_i32_0 : i32, i32
  }
  func.func @transform_3(%arg0: i32) -> (i32, i32, i32) {
    %c0_i32 = arith.constant 0 : i32
    %c0_i32_0 = arith.constant 0 : i32
    %c0_i32_1 = arith.constant 0 : i32
    return %arg0, %c0_i32, %c0_i32_0 : i32, i32, i32
  }
}

</mosaic_0001>

<bundles_post_ra>
// kernel: tpu_custom_call.1
= control target key start
LH: loop header
LB: loop body
LE: loop exit
PB: predicated region body
PF: predicated region fallthrough
CT: control target
= control target key end

     0   :  { %8 = vsyncpa [#allocation3], 0  ;;  %s1065_s0 = inlined_call_operand.hbm [shape: f32[512,128], index: 0, kind: input, shape index: {}]   ;;  %s1066_s1 = inlined_call_operand.vmem [shape: f32[1,128], index: 1, kind: input, shape index: {}]   ;;  %s1067_s2 = inlined_call_operand.vmem [shape: f32[1,128], index: 2, kind: input, shape index: {}]   ;;  %s1068_s3 = inlined_call_operand.hbm [shape: f32[2,8,128], index: 3, kind: output, shape index: {}]  }
   0x1   :  { %10 = vsyncpa [#allocation3 + $0x1], 0 }
   0x2   :  { %11 = vsyncpa [#allocation4], 0 }
   0x3   :  { %13 = vsyncpa [#allocation4 + $0x1], 0  ;;  %s796_s12 = smov 0   ;;  %s798_s13 = smov 0  }
   0x4   :  { %s800_s14 = smov 0   ;;  %s802_s15 = smov 0  }
   0x5 LB: > { %s817_s16 = sadd.s32 4294967295, %s770_s15   ;;  %s606_s17 = sadd.s32 4294967294, %s770_s15   ;;  %s770_s15 = sphi %s802_s15, %s1081_s15   ;;  %s766_s14 = sphi %s800_s14, %s1080_s14   ;;  %s762_s13 = sphi %s798_s13, %s1079_s13   ;;  %s758_s12 = sphi %s796_s12, %s1078_s12  }
   0x6   : > { %s821_s18 = sadd.s32 1, %s770_s15   ;;  %s26_s19 = sadd.s32 1, %s766_s14 }
   0x7   : > { %s23_s20 = ssub.s32 %s770_s15, %s821_s18  ;;  %p33_p0 = scmp.ne.s32.totalorder %s766_s14, %s762_s13 }
   0x8   : > { %p24_p1 = scmp.eq.s32.totalorder %s23_s20, 0  ;;  %p34_p2 = scmp.eq.s32.totalorder %s770_s15, 0 }
   0x9   : > { %p39_p3 = scmp.ne.s32.totalorder %s762_s13, %s758_s12  ;;  %p40_p4 = scmp.eq.s32.totalorder %s817_s16, 0 }
   0xa   : > { %s833_s21 = scalar_select %p24_p1, %s766_s14, %s26_s19  }
   0xb   : > { %p835_p5 = por %p34_p2, %p33_p0  ;;  %p839_p6 = por %p40_p4, %p39_p3 }
   0xc   : > { %p105_p7 = scmp.eq.s32.totalorder %s817_s16, 1  ;;  %p111_p8 = scmp.eq.s32.totalorder %s606_s17, 1 }
   0xd   : > { %p638_p10 = scmp.lt.s32.totalorder %s770_s15, 2  ;;  %s137_s26 = sand.u32 1, %s766_s14  }
   0xe   : > { %p846_p11 = por %p105_p7, %p33_p0  ;;  %p850_p12 = por %p111_p8, %p39_p3 }
   0xf   : > { %s621_s27 = sshll.u32 %s770_s15, 12  ;;  %s609_s28 = sshll.u32 %s137_s26, 8 }
  0x10   : > { %s1072_s24 = scalar_select %p846_p11, 1, 0 }
  0x11   : > { %s1073_s25 = scalar_select %p850_p12, 1, 0 }
  0x12   : > { %s859_s4 = scalar_lea.hbm %s1065_s0, %s621_s27  ;;  %s141_s5 = scalar_lea.vmem [#allocation2], %s609_s28 }
  0x13   : > { %s148_s6 = sshll.u32 %s141_s5, 4  ;;  %p863_p13 = pnand %p638_p10, %p835_p5  ;;  %s867_s6 = int_to_ptr.vmem [resolvable:$true] %s148_s6 }
  0x14   : > { %s869_s8 = scalar_lea.sflag [#allocation3], %s137_s26  ;;  %s674_s9 = scalar_lea.hbm %s859_s4, 4096 }
  0x15   : > { %p675_p0 = scmp.ne.s32.totalorder %s859_s4, %s674_s9  ;;  %p676_p1 = pneg %p863_p13 }
  0x16   : > { %s679_s17 = scalar_lea.hbm %s1065_s0, 8192  ;;  %p680_p4 = scmp.lt.u32.totalorder %s859_s4, %s1065_s0 }
  0x17   : > { %p677_p2 = pnand %p676_p1, %p675_p0  ;;  %p681_p5 = scmp.lt.u32.totalorder %s679_s17, %s674_s9 }
  0x18   : > { %p683_p8 = scmp.lt.u32.totalorder %s674_s9, %s859_s4 }
  0x19   : > { %p678_p3 = pneg %p677_p2  ;;  %p682_p7 = por %p681_p5, %p680_p4 }
  0x1b   : > { %p684_p10 = por %p683_p8, %p682_p7 }
  0x1d   : > { %p685_p9 = pnand %p684_p10, %p678_p3 }
  0x1f   : > { %688 = shalt.err (!%p685_p9)
}
  0x20   : > { %s689_s22 = scalar_lea.vmem %s867_s6, 4096  ;;  %s772_s26 = smov [#allocation2]  }
  0x21   : > { %p690_p0 = scmp.ne.s32.totalorder %s867_s6, %s689_s22  ;;  %s694_s27 = sshll.u32 %s772_s26, 4  ;;  %s695_s27 = int_to_ptr.vmem [resolvable:$false] %s694_s27 }
  0x22   : > { %s696_s28 = scalar_lea.vmem %s695_s27, 8192  ;;  %p697_p11 = scmp.lt.s32.totalorder %s867_s6, %s695_s27 }
  0x23   : > { %p692_p2 = pnand %p690_p0, %p676_p1  ;;  %p698_p4 = scmp.lt.s32.totalorder %s696_s28, %s689_s22 }
  0x25   : > { %p693_p12 = pneg %p692_p2  ;;  %p699_p5 = por %p698_p4, %p697_p11 }
  0x27   : > { %p700_p7 = pnand %p699_p5, %p693_p12 }
  0x29   : > { %703 = shalt.err (!%p700_p7)
}
  0x2a   : > { %s773_s29 = smov 128   ;;  %s774_s30 = smov 8  }
  0x2b   : > { %633 = dma.hbm_to_vmem [thread:$0]  (!%p863_p13), %s859_s4, 4096, %s867_s6, %s869_s8, %s773_s29, %s773_s29, %s774_s30  }
  0x2c   : > { %p612_p9 = scmp.ge.s32.totalorder %s770_s15, 1  ;;  %p156_p1 = scmp.lt.s32.totalorder %s770_s15, 3 }
  0x2e   : > { %p157_p3 = pnand %p612_p9, %p156_p1 }
  0x2f   : > { %s900_s5 = sand.u32 (!%p157_p3), 1, %s762_s13  }
  0x30   : > { %160 = sbr.rel (%p157_p3) target bundleno = 355 (0x163), region = 32  ;;  %s613_s9 = sshll.u32 (!%p157_p3), %s900_s5, 8 }
  0x31   : > { %s163_s10 = scalar_lea.sflag (!%p157_p3), [#allocation3], %s900_s5  ;;  %s904_s11 = scalar_lea.vmem (!%p157_p3), [#allocation2], %s613_s9 }
  0x37   : > { %749 = dma.done.wait (%p839_p6), %s163_s10, 4096  }
  0x38   : > { %751 = vsyncadd (%p839_p6), %s163_s10, 4294963200  ;;  %v190_v0 = vld [vmem:[%s904_s11] sm:$0xff]  ;;  %v191_v1 = vld [vmem:[%s904_s11 + $0x8] sm:$0xff]  ;;  %s614_s8 = sshll.u32 %s900_s5, 3  ;;  %s618_s17 = sshll.u32 %s817_s16, 7 }
  0x39   : > { %v915_v2 = vld [vmem:[%s1066_s1] ss:$0 sm:$0xff]  ;;  %v192_v3 = vld [vmem:[%s904_s11 + $0x10] sm:$0xff]  ;;  %v193_v6 = vld [vmem:[%s904_s11 + $0x18] sm:$0xff]  ;;  %s188_s20 = scalar_lea.vmem [#allocation5], %s614_s8  ;;  %s1021_s29 = scalar_lea.hbm %s1068_s3, %s618_s17 }
  0x3a   : > { %v229_v4 = vmul.f32 %v915_v2, %v190_v0  ;;  %v230_v5 = vmul.f32 %v915_v2, %v191_v1  ;;  %v924_v7 = vld [vmem:[%s1067_s2] ss:$0 sm:$0xff]  ;;  %v231_v8 = vmul.f32 %v915_v2, %v192_v3  ;;  %v195_v10 = vld [vmem:[%s904_s11 + $0x28] sm:$0xff]  ;;  %v232_v11 = vmul.f32 %v915_v2, %v193_v6  ;;  %v196_v16 = vld [vmem:[%s904_s11 + $0x30] sm:$0xff]  ;;  %s536_s22 = sshll.u32 %s188_s20, 4  ;;  %s523_s16 = scalar_lea.sflag [#allocation4], %s900_s5  ;;  %s1023_s22 = int_to_ptr.vmem [resolvable:$true] %s536_s22 }
  0x3b   : > { %v194_v9 = vld [vmem:[%s904_s11 + $0x20] sm:$0xff]  ;;  %v234_v17 = vmul.f32 %v915_v2, %v195_v10  ;;  %v197_v18 = vld [vmem:[%s904_s11 + $0x38] sm:$0xff]  ;;  %v235_v22 = vmul.f32 %v915_v2, %v196_v16  ;;  %v199_v28 = vld [vmem:[%s904_s11 + $0x48] sm:$0xff]  ;;  %s704_s30 = scalar_lea.vmem %s1023_s22, 128  ;;  %p1075_p11 = scmp.ne.s32.totalorder %s1072_s24, 0 }
  0x3c   : > { %v268_v12 = vadd.f32 %v924_v7, %v229_v4  ;;  %v269_v13 = vadd.f32 %v924_v7, %v230_v5  ;;  %v233_v14 = vmul.f32 %v915_v2, %v194_v9  ;;  %v270_v15 = vadd.f32 %v924_v7, %v231_v8  ;;  %v198_v25 = vld [vmem:[%s904_s11 + $0x40] sm:$0xff]  ;;  %v200_v32 = vld [vmem:[%s904_s11 + $0x50] sm:$0xff]  ;;  %v201_v40 = vld [vmem:[%s904_s11 + $0x58] sm:$0xff]  ;;  %p705_p6 = scmp.ne.s32.totalorder %s1023_s22, %s704_s30  ;;  %s775_s9 = smov [#allocation5]  }
  0x3d   : > { %v271_v19 = vadd.f32 %v924_v7, %v232_v11  ;;  %v236_v26 = vmul.f32 %v915_v2, %v197_v18  ;;  %v273_v27 = vadd.f32 %v924_v7, %v234_v17  ;;  %v237_v33 = vmul.f32 %v915_v2, %v198_v25  ;;  %v202_v45 = vld [vmem:[%s904_s11 + $0x60] sm:$0xff]  ;;  %v203_v54 = vld [vmem:[%s904_s11 + $0x68] sm:$0xff]  ;;  %v204_v62 = vld [vmem:[%s904_s11 + $0x70] sm:$0xff]  ;;  %s708_s10 = sshll.u32 %s775_s9, 4  ;;  %s709_s10 = int_to_ptr.vmem [resolvable:$false] %s708_s10 }
  0x3e   : > { %v300_v20 = vmax.f32 %v268_v12, 0.0  ;;  %v301_v21 = vmax.f32 %v269_v13, 0.0  ;;  %v272_v23 = vadd.f32 %v924_v7, %v233_v14  ;;  %v302_v24 = vmax.f32 %v270_v15, 0.0  ;;  %v205_v9 = vld [vmem:[%s904_s11 + $0x78] sm:$0xff]  ;;  %v206_v18 = vld [vmem:[%s904_s11 + $0x80] sm:$0xff]  ;;  %p706_p12 = pnand %p705_p6, %p1075_p11  ;;  %p711_p8 = scmp.lt.s32.totalorder %s1023_s22, %s709_s10 }
  0x3f   : > { %v303_v29 = vmax.f32 %v271_v19, 0.0  ;;  %v274_v34 = vadd.f32 %v924_v7, %v235_v22  ;;  %v238_v37 = vmul.f32 %v915_v2, %v199_v28  ;;  %v275_v38 = vadd.f32 %v924_v7, %v236_v26 }
  0x40   : > { %v332_v30 = vmin.f32 %v300_v20, 1.0  ;;  %v333_v31 = vmin.f32 %v301_v21, 1.0  ;;  %v304_v35 = vmax.f32 %v272_v23, 0.0  ;;  %v334_v36 = vmin.f32 %v302_v24, 1.0  ;;  %p707_p13 = pneg %p706_p12 }
  0x41   : > { %v305_v39 = vmax.f32 %v273_v27, 0.0  ;;  %v335_v41 = vmin.f32 %v303_v29, 1.0  ;;  %v239_v44 = vmul.f32 %v915_v2, %v200_v32  ;;  %v276_v46 = vadd.f32 %v924_v7, %v237_v33  ;;  %v207_v27 = vld [vmem:[%s904_s11 + $0x88] sm:$0xff] }
  0x42   : > { %v364_v42 = vmul.f32 %v332_v30, %v332_v30  ;;  %v365_v43 = vmul.f32 %v333_v31, %v333_v31  ;;  %v306_v47 = vmax.f32 %v274_v34, 0.0  ;;  %v336_v48 = vmin.f32 %v304_v35, 1.0 }
  0x43   : > { %v366_v49 = vmul.f32 %v334_v36, %v334_v36  ;;  %v240_v50 = vmul.f32 %v915_v2, %v201_v40  ;;  %v277_v51 = vadd.f32 %v924_v7, %v238_v37  ;;  %v307_v52 = vmax.f32 %v275_v38, 0.0 }
  0x44   : > { %v337_v53 = vmin.f32 %v305_v39, 1.0  ;;  %v367_v55 = vmul.f32 %v335_v41, %v335_v41  ;;  %v396_v56 = vadd.f32 %v365_v43, %v364_v42  ;;  %v436_v57 = vand.u32 2147483647, %v332_v30 }
  0x45   : > { %v437_v58 = vand.u32 2147483647, %v333_v31  ;;  %v241_v59 = vmul.f32 %v915_v2, %v202_v45  ;;  %v278_v60 = vadd.f32 %v924_v7, %v239_v44  ;;  %v438_v61 = vand.u32 2147483647, %v334_v36  ;;  %v208_v36 = vld [vmem:[%s904_s11 + $0x90] sm:$0xff]  ;;  %v209_v45 = vld [vmem:[%s904_s11 + $0x98] sm:$0xff] }
  0x46   : > { %v308_v63 = vmax.f32 %v276_v46, 0.0  ;;  %v338_v0 = vmin.f32 %v306_v47, 1.0  ;;  %v368_v1 = vmul.f32 %v336_v48, %v336_v48  ;;  %v397_v3 = vadd.f32 %v396_v56, %v366_v49 }
  0x47   : > { %v242_v4 = vmul.f32 %v915_v2, %v203_v54  ;;  %v279_v5 = vadd.f32 %v924_v7, %v240_v50  ;;  %v439_v6 = vand.u32 2147483647, %v335_v41  ;;  %v468_v8 = vadd.f32 %v437_v58, %v436_v57  ;;  %v210_v54 = vld [vmem:[%s904_s11 + $0xa0] sm:$0xff] }
  0x48   : > { %v309_v10 = vmax.f32 %v277_v51, 0.0  ;;  %v339_v11 = vmin.f32 %v307_v52, 1.0  ;;  %v369_v12 = vmul.f32 %v337_v53, %v337_v53  ;;  %v398_v13 = vadd.f32 %v397_v3, %v367_v55 }
  0x49   : > { %v243_v14 = vmul.f32 %v915_v2, %v204_v62  ;;  %v280_v15 = vadd.f32 %v924_v7, %v241_v59  ;;  %v440_v16 = vand.u32 2147483647, %v336_v48  ;;  %v469_v17 = vadd.f32 %v468_v8, %v438_v61 }
  0x4a   : > { %v310_v19 = vmax.f32 %v278_v60, 0.0  ;;  %v340_v20 = vmin.f32 %v308_v63, 1.0  ;;  %v370_v21 = vmul.f32 %v338_v0, %v338_v0  ;;  %v399_v22 = vadd.f32 %v398_v13, %v368_v1  ;;  %v211_v63 = vld [vmem:[%s904_s11 + $0xa8] sm:$0xff] }
  0x4b   : > { %v244_v23 = vmul.f32 %v915_v2, %v205_v9  ;;  %v281_v24 = vadd.f32 %v924_v7, %v242_v4  ;;  %v441_v25 = vand.u32 2147483647, %v337_v53  ;;  %v470_v26 = vadd.f32 %v469_v17, %v439_v6 }
  0x4c   : > { %v311_v28 = vmax.f32 %v279_v5, 0.0  ;;  %v341_v29 = vmin.f32 %v309_v10, 1.0  ;;  %v371_v30 = vmul.f32 %v339_v11, %v339_v11  ;;  %v400_v31 = vadd.f32 %v399_v22, %v369_v12  ;;  %v212_v10 = vld [vmem:[%s904_s11 + $0xb0] sm:$0xff] }
  0x4d   : > { %v245_v32 = vmul.f32 %v915_v2, %v206_v18  ;;  %v282_v33 = vadd.f32 %v924_v7, %v243_v14  ;;  %v442_v34 = vand.u32 2147483647, %v338_v0  ;;  %v471_v35 = vadd.f32 %v470_v26, %v440_v16 }
  0x4e   : > { %v312_v37 = vmax.f32 %v280_v15, 0.0  ;;  %v342_v38 = vmin.f32 %v310_v19, 1.0  ;;  %v372_v39 = vmul.f32 %v340_v20, %v340_v20  ;;  %v401_v40 = vadd.f32 %v400_v31, %v370_v21  ;;  %v213_v19 = vld [vmem:[%s904_s11 + $0xb8] sm:$0xff] }
  0x4f   : > { %v246_v41 = vmul.f32 %v915_v2, %v207_v27  ;;  %v283_v42 = vadd.f32 %v924_v7, %v244_v23  ;;  %v443_v43 = vand.u32 2147483647, %v339_v11  ;;  %v472_v44 = vadd.f32 %v471_v35, %v441_v25 }
  0x50   : > { %v313_v46 = vmax.f32 %v281_v24, 0.0  ;;  %v343_v47 = vmin.f32 %v311_v28, 1.0  ;;  %v373_v48 = vmul.f32 %v341_v29, %v341_v29  ;;  %v402_v49 = vadd.f32 %v401_v40, %v371_v30  ;;  %v214_v28 = vld [vmem:[%s904_s11 + $0xc0] sm:$0xff] }
  0x51   : > { %v247_v50 = vmul.f32 %v915_v2, %v208_v36  ;;  %v284_v51 = vadd.f32 %v924_v7, %v245_v32  ;;  %v444_v52 = vand.u32 2147483647, %v340_v20  ;;  %v473_v53 = vadd.f32 %v472_v44, %v442_v34 }
  0x52   : > { %v314_v55 = vmax.f32 %v282_v33, 0.0  ;;  %v344_v56 = vmin.f32 %v312_v37, 1.0  ;;  %v374_v57 = vmul.f32 %v342_v38, %v342_v38  ;;  %v403_v58 = vadd.f32 %v402_v49, %v372_v39  ;;  %v215_v37 = vld [vmem:[%s904_s11 + $0xc8] sm:$0xff] }
  0x53   : > { %v248_v59 = vmul.f32 %v915_v2, %v209_v45  ;;  %v285_v60 = vadd.f32 %v924_v7, %v246_v41  ;;  %v445_v61 = vand.u32 2147483647, %v341_v29  ;;  %v474_v62 = vadd.f32 %v473_v53, %v443_v43 }
  0x54   : > { %v315_v0 = vmax.f32 %v283_v42, 0.0  ;;  %v345_v1 = vmin.f32 %v313_v46, 1.0  ;;  %v375_v3 = vmul.f32 %v343_v47, %v343_v47  ;;  %v404_v4 = vadd.f32 %v403_v58, %v373_v48  ;;  %v216_v46 = vld [vmem:[%s904_s11 + $0xd0] sm:$0xff] }
  0x55   : > { %v249_v5 = vmul.f32 %v915_v2, %v210_v54  ;;  %v286_v6 = vadd.f32 %v924_v7, %v247_v50  ;;  %v446_v8 = vand.u32 2147483647, %v342_v38  ;;  %v475_v9 = vadd.f32 %v474_v62, %v444_v52 }
  0x56   : > { %v316_v11 = vmax.f32 %v284_v51, 0.0  ;;  %v346_v12 = vmin.f32 %v314_v55, 1.0  ;;  %v376_v13 = vmul.f32 %v344_v56, %v344_v56  ;;  %v405_v14 = vadd.f32 %v404_v4, %v374_v57  ;;  %v217_v55 = vld [vmem:[%s904_s11 + $0xd8] sm:$0xff] }
  0x57   : > { %v250_v15 = vmul.f32 %v915_v2, %v211_v63  ;;  %v287_v16 = vadd.f32 %v924_v7, %v248_v59  ;;  %v447_v17 = vand.u32 2147483647, %v343_v47  ;;  %v476_v18 = vadd.f32 %v475_v9, %v445_v61 }
  0x58   : > { %v317_v20 = vmax.f32 %v285_v60, 0.0  ;;  %v347_v21 = vmin.f32 %v315_v0, 1.0  ;;  %v377_v22 = vmul.f32 %v345_v1, %v345_v1  ;;  %v406_v23 = vadd.f32 %v405_v14, %v375_v3  ;;  %v218_v0 = vld [vmem:[%s904_s11 + $0xe0] sm:$0xff] }
  0x59   : > { %v251_v24 = vmul.f32 %v915_v2, %v212_v10  ;;  %v288_v25 = vadd.f32 %v924_v7, %v249_v5  ;;  %v448_v26 = vand.u32 2147483647, %v344_v56  ;;  %v477_v27 = vadd.f32 %v476_v18, %v446_v8 }
  0x5a   : > { %v318_v29 = vmax.f32 %v286_v6, 0.0  ;;  %v348_v30 = vmin.f32 %v316_v11, 1.0  ;;  %v378_v31 = vmul.f32 %v346_v12, %v346_v12  ;;  %v407_v32 = vadd.f32 %v406_v23, %v376_v13  ;;  %v219_v11 = vld [vmem:[%s904_s11 + $0xe8] sm:$0xff] }
  0x5b   : > { %v252_v33 = vmul.f32 %v915_v2, %v213_v19  ;;  %v289_v34 = vadd.f32 %v924_v7, %v250_v15  ;;  %v449_v35 = vand.u32 2147483647, %v345_v1  ;;  %v478_v36 = vadd.f32 %v477_v27, %v447_v17 }
  0x5c   : > { %v319_v38 = vmax.f32 %v287_v16, 0.0  ;;  %v349_v39 = vmin.f32 %v317_v20, 1.0  ;;  %v379_v40 = vmul.f32 %v347_v21, %v347_v21  ;;  %v408_v41 = vadd.f32 %v407_v32, %v377_v22  ;;  %v220_v20 = vld [vmem:[%s904_s11 + $0xf0] sm:$0xff] }
  0x5d   : > { %v253_v42 = vmul.f32 %v915_v2, %v214_v28  ;;  %v290_v43 = vadd.f32 %v924_v7, %v251_v24  ;;  %v450_v44 = vand.u32 2147483647, %v346_v12  ;;  %v479_v45 = vadd.f32 %v478_v36, %v448_v26 }
  0x5e   : > { %v320_v47 = vmax.f32 %v288_v25, 0.0  ;;  %v350_v48 = vmin.f32 %v318_v29, 1.0  ;;  %v380_v49 = vmul.f32 %v348_v30, %v348_v30  ;;  %v409_v50 = vadd.f32 %v408_v41, %v378_v31  ;;  %v221_v29 = vld [vmem:[%s904_s11 + $0xf8] sm:$0xff]  ;;  %s710_s11 = scalar_lea.vmem %s709_s10, 256 }
  0x5f   : > { %v254_v51 = vmul.f32 %v915_v2, %v215_v37  ;;  %v291_v52 = vadd.f32 %v924_v7, %v252_v33  ;;  %v451_v53 = vand.u32 2147483647, %v347_v21  ;;  %v480_v54 = vadd.f32 %v479_v45, %v449_v35  ;;  %p712_p10 = scmp.lt.s32.totalorder %s710_s11, %s704_s30 }
  0x60   : > { %v321_v56 = vmax.f32 %v289_v34, 0.0  ;;  %v351_v57 = vmin.f32 %v319_v38, 1.0  ;;  %v381_v58 = vmul.f32 %v349_v39, %v349_v39  ;;  %v410_v59 = vadd.f32 %v409_v50, %v379_v40 }
  0x61   : > { %v255_v60 = vmul.f32 %v915_v2, %v216_v46  ;;  %v292_v61 = vadd.f32 %v924_v7, %v253_v42  ;;  %v452_v62 = vand.u32 2147483647, %v348_v30  ;;  %v481_v63 = vadd.f32 %v480_v54, %v450_v44  ;;  %p713_p0 = por %p712_p10, %p711_p8 }
  0x62   : > { %v322_v1 = vmax.f32 %v290_v43, 0.0  ;;  %v352_v3 = vmin.f32 %v320_v47, 1.0  ;;  %v382_v4 = vmul.f32 %v350_v48, %v350_v48  ;;  %v411_v5 = vadd.f32 %v410_v59, %v380_v49 }
  0x63   : > { %v256_v6 = vmul.f32 %v915_v2, %v217_v55  ;;  %v293_v8 = vadd.f32 %v924_v7, %v254_v51  ;;  %v453_v9 = vand.u32 2147483647, %v349_v39  ;;  %v482_v10 = vadd.f32 %v481_v63, %v451_v53  ;;  %p714_p2 = pnand %p713_p0, %p707_p13 }
  0x64   : > { %v323_v12 = vmax.f32 %v291_v52, 0.0  ;;  %v353_v13 = vmin.f32 %v321_v56, 1.0  ;;  %v383_v14 = vmul.f32 %v351_v57, %v351_v57  ;;  %v412_v15 = vadd.f32 %v411_v5, %v381_v58 }
  0x65   : > { %v257_v16 = vmul.f32 %v915_v2, %v218_v0  ;;  %v294_v17 = vadd.f32 %v924_v7, %v255_v60  ;;  %v454_v18 = vand.u32 2147483647, %v350_v48  ;;  %v483_v19 = vadd.f32 %v482_v10, %v452_v62 }
  0x66   : > { %v324_v21 = vmax.f32 %v292_v61, 0.0  ;;  %v354_v22 = vmin.f32 %v322_v1, 1.0  ;;  %v384_v23 = vmul.f32 %v352_v3, %v352_v3  ;;  %v413_v24 = vadd.f32 %v412_v15, %v382_v4 }
  0x67   : > { %v258_v25 = vmul.f32 %v915_v2, %v219_v11  ;;  %v295_v26 = vadd.f32 %v924_v7, %v256_v6  ;;  %v455_v27 = vand.u32 2147483647, %v351_v57  ;;  %v484_v28 = vadd.f32 %v483_v19, %v453_v9 }
  0x68   : > { %v325_v30 = vmax.f32 %v293_v8, 0.0  ;;  %v355_v31 = vmin.f32 %v323_v12, 1.0  ;;  %v385_v32 = vmul.f32 %v353_v13, %v353_v13  ;;  %v414_v33 = vadd.f32 %v413_v24, %v383_v14 }
  0x69   : > { %v259_v34 = vmul.f32 %v915_v2, %v220_v20  ;;  %v296_v35 = vadd.f32 %v924_v7, %v257_v16  ;;  %v456_v36 = vand.u32 2147483647, %v352_v3  ;;  %v485_v37 = vadd.f32 %v484_v28, %v454_v18 }
  0x6a   : > { %v326_v38 = vmax.f32 %v294_v17, 0.0  ;;  %v356_v39 = vmin.f32 %v324_v21, 1.0  ;;  %v386_v40 = vmul.f32 %v354_v22, %v354_v22  ;;  %v415_v41 = vadd.f32 %v414_v33, %v384_v23 }
  0x6b   : > { %v260_v42 = vmul.f32 %v915_v2, %v221_v29  ;;  %v297_v43 = vadd.f32 %v924_v7, %v258_v25  ;;  %v457_v44 = vand.u32 2147483647, %v353_v13  ;;  %v486_v45 = vadd.f32 %v485_v37, %v455_v27 }
  0x6c   : > { %v327_v46 = vmax.f32 %v295_v26, 0.0  ;;  %v357_v47 = vmin.f32 %v325_v30, 1.0  ;;  %v387_v48 = vmul.f32 %v355_v31, %v355_v31  ;;  %v416_v49 = vadd.f32 %v415_v41, %v385_v32 }
  0x6d   : > { %v298_v50 = vadd.f32 %v924_v7, %v259_v34  ;;  %v458_v51 = vand.u32 2147483647, %v354_v22  ;;  %v487_v52 = vadd.f32 %v486_v45, %v456_v36  ;;  %v328_v53 = vmax.f32 %v296_v35, 0.0 }
  0x6e   : > { %v358_v54 = vmin.f32 %v326_v38, 1.0  ;;  %v388_v55 = vmul.f32 %v356_v39, %v356_v39  ;;  %v417_v56 = vadd.f32 %v416_v49, %v386_v40  ;;  %v299_v57 = vadd.f32 %v924_v7, %v260_v42 }
  0x6f   : > { %v459_v58 = vand.u32 2147483647, %v355_v31  ;;  %v488_v2 = vadd.f32 %v487_v52, %v457_v44  ;;  %v329_v59 = vmax.f32 %v297_v43, 0.0  ;;  %v359_v60 = vmin.f32 %v327_v46, 1.0 }
  0x70   : > { %v389_v61 = vmul.f32 %v357_v47, %v357_v47  ;;  %v418_v62 = vadd.f32 %v417_v56, %v387_v48  ;;  %v460_v63 = vand.u32 2147483647, %v356_v39  ;;  %v330_v1 = vmax.f32 %v298_v50, 0.0 }
  0x71   : > { %v489_v0 = vadd.f32 %v488_v2, %v458_v51  ;;  %v360_v3 = vmin.f32 %v328_v53, 1.0  ;;  %v390_v4 = vmul.f32 %v358_v54, %v358_v54  ;;  %v461_v6 = vand.u32 2147483647, %v357_v47 }
  0x72   : > { %v419_v5 = vadd.f32 %v418_v62, %v388_v55  ;;  %v331_v9 = vmax.f32 %v299_v57, 0.0  ;;  %v361_v10 = vmin.f32 %v329_v59, 1.0  ;;  %v391_v11 = vmul.f32 %v359_v60, %v359_v60 }
  0x73   : > { %v490_v8 = vadd.f32 %v489_v0, %v459_v58  ;;  %v462_v13 = vand.u32 2147483647, %v358_v54  ;;  %v362_v14 = vmin.f32 %v330_v1, 1.0  ;;  %v392_v15 = vmul.f32 %v360_v3, %v360_v3 }
  0x74   : > { %v420_v12 = vadd.f32 %v419_v5, %v389_v61  ;;  %v463_v17 = vand.u32 2147483647, %v359_v60  ;;  %v363_v19 = vmin.f32 %v331_v9, 1.0  ;;  %v393_v20 = vmul.f32 %v361_v10, %v361_v10 }
  0x75   : > { %v491_v7 = vadd.f32 %v490_v8, %v460_v63  ;;  %v464_v22 = vand.u32 2147483647, %v360_v3  ;;  %v394_v24 = vmul.f32 %v362_v14, %v362_v14  ;;  %v465_v26 = vand.u32 2147483647, %v361_v10 }
  0x76   : > { %v421_v16 = vadd.f32 %v420_v12, %v390_v4  ;;  %v395_v28 = vmul.f32 %v363_v19, %v363_v19  ;;  %v466_v30 = vand.u32 2147483647, %v362_v14  ;;  %v467_v33 = vand.u32 2147483647, %v363_v19 }
  0x77   : > { %v492_v18 = vadd.f32 %v491_v7, %v461_v6  ;;  %v508_v52 = vlaneseq }
  0x78   : > { %v422_v21 = vadd.f32 %v421_v16, %v391_v11 }
  0x79   : > { %v493_v23 = vadd.f32 %v492_v18, %v462_v13  ;;  %v509_v53 = vshrl.u32 %v508_v52, 7  ;;  %v511_v54 = vand.u32 127, %v508_v52 }
  0x7a   : > { %v423_v25 = vadd.f32 %v422_v21, %v392_v15 }
  0x7b   : > { %v494_v27 = vadd.f32 %v493_v23, %v463_v17  ;;  %vm512_vm0 = vcmp.eq.s32.totalorder %v509_v53, 0  ;;  %vm515_vm1 = vcmp.eq.s32.totalorder %v511_v54, 1  ;;  %vm513_vm2 = vcmp.eq.s32.totalorder %v511_v54, 0 }
  0x7c   : > { %v424_v29 = vadd.f32 %v423_v25, %v393_v20  ;;  %vm516_vm3 = vmand %vm512_vm0, %vm515_vm1 }
  0x7d   : > { %v495_v31 = vadd.f32 %v494_v27, %v464_v22  ;;  %vm514_vm4 = vmand %vm512_vm0, %vm513_vm2 }
  0x7e   : > { %v425_v32 = vadd.f32 %v424_v29, %v394_v24 }
  0x7f   : > { %v496_v34 = vadd.f32 %v495_v31, %v465_v26 }
  0x80   : > { %v426_v35 = vadd.f32 %v425_v32, %v395_v28 }
  0x81   : > { %v497_v36 = vadd.f32 %v496_v34, %v466_v30 }
  0x82   : > { %427 = vadd.xlane.f32.xlu0 %v426_v35 }
  0x83   : > { %v498_v37 = vadd.f32 %v497_v36, %v467_v33 }
  0x86   : > { %499 = vadd.xlane.f32.xlu0 %v498_v37 }
 0x10f   : > { %v428_v38 = vpop.xlane.xlu0 %427 }
 0x110   : > { %v429_v39 = vrot.slane %v428_v38, 4 }
 0x112   : > { %v430_v40 = vadd.f32 %v429_v39, %v428_v38 }
 0x113   : > { %v500_v41 = vpop.xlane.xlu0 %499 }
 0x114   : > { %v431_v42 = vrot.slane %v430_v40, 2  ;;  %v501_v43 = vrot.slane %v500_v41, 4 }
 0x116   : > { %v502_v44 = vadd.f32 %v501_v43, %v500_v41  ;;  %v432_v45 = vadd.f32 %v431_v42, %v430_v40 }
 0x118   : > { %v503_v46 = vrot.slane %v502_v44, 2  ;;  %v433_v47 = vrot.slane %v432_v45, 1 }
 0x11a   : > { %v504_v48 = vadd.f32 %v503_v46, %v502_v44  ;;  %v434_v49 = vadd.f32 %v433_v47, %v432_v45 }
 0x11c   : > { %622 = vpush %v434_v49  ;;  %v505_v50 = vrot.slane %v504_v48, 1 }
 0x11e   : > { %v506_v51 = vadd.f32 %v505_v50, %v504_v48 }
 0x120   : > { %624 = vpush %v506_v51 }
 0x14d   : > { %s623_s19 = spop %622 }
 0x14e   : > { %v519_v56 = vstv %s623_s19 }
 0x151   : > { %s625_s26 = spop %624 }
 0x152   : > { %v517_v55 = vstv %s625_s26 }
 0x153   : > { %v518_v57 = vsel %vm516_vm3, %v517_v55, 0.0 }
 0x154   : > { %v520_v58 = vsel %vm514_vm4, %v519_v56, %v518_v57 }
 0x155   : > { %521 = vst [vmem:[%s188_s20] sm:$0xff] %v520_v58 }
 0x156   : > { %717 = shalt.err (!%p714_p2)
}
 0x157   : > { %s718_s5 = scalar_lea.hbm %s1021_s29, 128  ;;  %s722_s23 = scalar_lea.hbm %s1068_s3, 256 }
 0x158   : > { %p719_p4 = scmp.ne.s32.totalorder %s1021_s29, %s718_s5  ;;  %p723_p9 = scmp.lt.u32.totalorder %s1021_s29, %s1068_s3 }
 0x159   : > { %p724_p1 = scmp.lt.u32.totalorder %s722_s23, %s718_s5  ;;  %p726_p6 = scmp.lt.u32.totalorder %s718_s5, %s1021_s29 }
 0x15a   : > { %p720_p5 = pnand %p719_p4, %p1075_p11 }
 0x15b   : > { %p725_p3 = por %p724_p1, %p723_p9 }
 0x15c   : > { %p721_p7 = pneg %p720_p5 }
 0x15d   : > { %p727_p12 = por %p726_p6, %p725_p3 }
 0x15f   : > { %p728_p13 = pnand %p727_p12, %p721_p7 }
 0x161   : > { %731 = shalt.err (!%p728_p13)
}
 0x162   : > { %628 = dma.vmem_to_hbm [thread:$0]  (%p1075_p11), %s1023_s22, 128, %s1021_s29, %s523_s16  }
 0x163 PF: > { %s548_s17 = sand.u32 1, %s758_s12   ;;  %p1076_p8 = scmp.ne.s32.totalorder %s1073_s25, 0 }
 0x164   : > { %p1077_p10 = scmp.ge.s32.totalorder %s770_s15, 2  ;;  %s549_s19 = scalar_lea.sflag [#allocation4], %s548_s17 }
 0x166   : > { %p635_p0 = pnand %p1077_p10, %p1076_p8 }
 0x168   : > { %753 = dma.done.wait (!%p635_p0), %s549_s19, 128  }
 0x169   : > { %755 = vsyncadd (!%p635_p0), %s549_s19, 4294967168  ;;  %p16_p2 = scmp.ge.s32.totalorder %s821_s18, 4   ;;  %s1078_s12 = smov %s762_s13 }
 0x16a   : > { %s1079_s13 = smov %s766_s14  ;;  %s1080_s14 = smov %s833_s21 }
 0x16b   : > { %s1081_s15 = smov %s821_s18  ;;  %18 = sbr.rel (!%p16_p2) target bundleno = 5 (0x5), region = 77 }
 0x172   :  { %554 = vsyncpa [#allocation3], 1 }
 0x173   :  { %556 = vsyncpa [#allocation3 + $0x1], 1 }
 0x174   :  { %557 = vsyncpa [#allocation4], 1 }
 0x175   :  { %559 = vsyncpa [#allocation4 + $0x1], 1 }

</bundles_post_ra>
